<compile_context>
chip_gen: v5e
topology: v5e:2x2
jax: 0.10.0
libtpu: 0.0.40
codegen_flags: <defaults>
</compile_context>

<pallas_src>
import jax
import jax.numpy as jnp
from jax.experimental import pallas as pl
from jax.experimental.pallas import tpu as pltpu

FEAT_DIM = 256      # shared_cnn output width expected by the Critic head
HIDDEN = 100        # fc_value logical width (as in the PyTorch module)


def _round_up(n, m):
    return ((n + m - 1) // m) * m


def critic_kernel(x_ref, wc_ref, bc_ref, w1_ref, b1_ref, w2_ref, b2_ref, out_ref):
    # shared_cnn stand-in: relu(x @ Wc + bc)  (bf16 MXU inputs, f32 accumulate,
    # f32 bias/ReLU on the VPU).
    feat = jnp.dot(x_ref[...], wc_ref[...], preferred_element_type=jnp.float32)
    feat = jnp.maximum(feat + bc_ref[...], 0.0)

    # fc_value: relu(feat @ W1 + b1)   (W1 zero-padded 100 -> 128 lanes)
    h = jnp.dot(feat.astype(w1_ref.dtype), w1_ref[...],
                preferred_element_type=jnp.float32)
    h = jnp.maximum(h + b1_ref[...], 0.0)

    # value_head: N=1 projection kept off the MXU -> VPU multiply + lane
    # reduction (XLU). Padded lanes of w2 are zero, so this equals h @ w2 + b2.
    out_ref[...] = (jnp.sum(h * w2_ref[...], axis=-1, keepdims=True)
                    + b2_ref[0, 0])


def init_params(key, in_dim, feat_dim=FEAT_DIM, hidden=HIDDEN):
    """Orthogonal init mirroring layer_init (std=1.41 trunk/fc_value, std=1 head)."""
    k_c, k_1, k_2 = jax.random.split(key, 3)
    orth = jax.nn.initializers.orthogonal
    wc = orth(scale=1.41)(k_c, (in_dim, feat_dim), jnp.float32)
    bc = jnp.zeros((feat_dim,), jnp.float32)
    w1 = orth(scale=1.41)(k_1, (feat_dim, hidden), jnp.float32)   # fc_value
    b1 = jnp.zeros((hidden,), jnp.float32)
    w2 = orth(scale=1.0)(k_2, (hidden, 1), jnp.float32)           # value_head
    b2 = jnp.zeros((1,), jnp.float32)
    return (wc, bc, w1, b1, w2, b2)


def _choose_tm(batch, in_dim, feat_dim, hidden_pad,
               vmem_budget=24 * 1024 * 1024):
    """MXU-friendly batch tile (<=256), shrunk until double-buffered x tiles +
    VMEM-resident weights fit well under the scoped VMEM limit (v7x-safe)."""
    weight_bytes = ((in_dim * feat_dim + feat_dim * hidden_pad) * 2      # bf16 W
                    + (feat_dim + 2 * hidden_pad + 8) * 4)               # f32 biases

    def need(tm):
        x_tiles = 2 * tm * in_dim * 2               # double-buffered bf16 x tile
        out_tiles = 2 * tm * 4                      # double-buffered f32 out tile
        act = tm * (feat_dim + hidden_pad) * 4      # f32 intermediates
        return x_tiles + out_tiles + act + weight_bytes

    tm = 256
    while tm > 16 and need(tm) > vmem_budget:
        tm //= 2
    # keep a multiple of 16 (bf16 sublane packing) and don't exceed the batch
    return max(16, min(tm, _round_up(batch, 16)))


def critic_forward(x, params, compute_dtype=jnp.bfloat16):
    wc, bc, w1, b1, w2, b2 = params
    B = x.shape[0]
    in_dim = wc.shape[0]
    feat_dim = wc.shape[1]
    hidden = w1.shape[1]
    hidden_pad = _round_up(hidden, 128)

    x_flat = x.reshape(B, -1).astype(jnp.float32)
    assert x_flat.shape[1] == in_dim

    # Zero-pad fc_value / value_head from 100 -> 128 lanes.  relu(0 + 0) = 0 and
    # the padded w2 lanes are zero, so the result is unchanged.
    w1p = jnp.zeros((feat_dim, hidden_pad), jnp.float32).at[:, :hidden].set(w1)
    b1p = jnp.zeros((1, hidden_pad), jnp.float32).at[0, :hidden].set(b1)
    w2p = jnp.zeros((1, hidden_pad), jnp.float32).at[0, :hidden].set(w2[:, 0])

    tm = _choose_tm(B, in_dim, feat_dim, hidden_pad)
    nb = pl.cdiv(B, tm)
    b_pad = nb * tm
    if b_pad != B:
        x_flat = jnp.pad(x_flat, ((0, b_pad - B), (0, 0)))

    # bf16 activations / matmul weights (f32 accumulation inside the kernel).
    x_lp = x_flat.astype(compute_dtype)
    wc_lp = wc.astype(compute_dtype)
    w1_lp = w1p.astype(compute_dtype)
    bc2 = bc.reshape(1, feat_dim)
    b2s = b2.reshape(1, 1)

    out = pl.pallas_call(
        critic_kernel,
        out_shape=jax.ShapeDtypeStruct((b_pad, 1), jnp.float32),
        grid=(nb,),
        in_specs=[
            # activation tile: pipelined along the batch grid axis
            pl.BlockSpec((tm, in_dim), lambda i: (i, 0)),
            # weights / biases: constant block index -> VMEM-resident, no re-DMA
            pl.BlockSpec((in_dim, feat_dim), lambda i: (0, 0)),
            pl.BlockSpec((1, feat_dim), lambda i: (0, 0)),
            pl.BlockSpec((feat_dim, hidden_pad), lambda i: (0, 0)),
            pl.BlockSpec((1, hidden_pad), lambda i: (0, 0)),
            pl.BlockSpec((1, hidden_pad), lambda i: (0, 0)),
            # final bias as an SMEM scalar (avoids a padded (8,128) VMEM tile)
            pl.BlockSpec(memory_space=pltpu.MemorySpace.SMEM),
        ],
        out_specs=pl.BlockSpec((tm, 1), lambda i: (i, 0)),
        compiler_params=pltpu.CompilerParams(
            dimension_semantics=("parallel",),
            vmem_limit_bytes=32 * 1024 * 1024,
        ),
    )(x_lp, wc_lp, bc2, w1_lp, b1p, w2_lp if False else w2p, b2s)

    return out[:B]


def critic_reference(x, params, compute_dtype=jnp.bfloat16):
    """Pure-JAX reference using the same dtype policy as the kernel."""
    wc, bc, w1, b1, w2, b2 = params
    B = x.shape[0]
    xf = x.reshape(B, -1).astype(jnp.float32)
    feat = jnp.maximum(
        jnp.dot(xf.astype(compute_dtype), wc.astype(compute_dtype),
                preferred_element_type=jnp.float32) + bc, 0.0)
    h = jnp.maximum(
        jnp.dot(feat.astype(compute_dtype), w1.astype(compute_dtype),
                preferred_element_type=jnp.float32) + b1, 0.0)
    return h @ w2 + b2


if __name__ == "__main__":
    key = jax.random.PRNGKey(0)
    k_x, k_p = jax.random.split(key)

    B, C, H, W = 2, 4, 16, 16          # NCHW, like PyTorch conv inputs
    x = jax.random.normal(k_x, (B, C, H, W), jnp.float32)
    params = init_params(k_p, in_dim=C * H * W)

    out = jax.block_until_ready(critic_forward(x, params))
    ref = critic_reference(x, params)

    assert out.shape == (B, 1)
    assert jnp.allclose(out, ref, atol=2e-3, rtol=2e-3), \
        f"max abs diff = {float(jnp.max(jnp.abs(out - ref)))}"

    print("KERNEL_OK")
</pallas_src>

<mosaic_0001>
module attributes {stable_mosaic.version = 11 : i64} {
  func.func @critic_kernel(%arg0: i32, %arg1: memref<16x1024xbf16, #tpu.memory_space<vmem>>, %arg2: memref<1024x256xbf16, #tpu.memory_space<vmem>>, %arg3: memref<1x256xf32, #tpu.memory_space<vmem>>, %arg4: memref<256x128xbf16, #tpu.memory_space<vmem>>, %arg5: memref<1x128xf32, #tpu.memory_space<vmem>>, %arg6: memref<1x128xf32, #tpu.memory_space<vmem>>, %arg7: memref<1x1xf32, #tpu.memory_space<smem>>, %arg8: memref<16x1xf32, #tpu.memory_space<vmem>>) attributes {dimension_semantics = [#tpu.dimension_semantics<parallel>], iteration_bounds = array<i64: 1>, scalar_prefetch = 0 : i64, scratch_operands = 0 : i64, tpu.core_type = #tpu.core_type<tc>, window_params = [{transform_indices = @transform_0, window_bounds = array<i64: 16, 1024>}, {pipeline_mode = #tpu.pipeline_mode<synchronous>, transform_indices = @transform_1, window_bounds = array<i64: 1024, 256>}, {pipeline_mode = #tpu.pipeline_mode<synchronous>, transform_indices = @transform_2, window_bounds = array<i64: 1, 256>}, {pipeline_mode = #tpu.pipeline_mode<synchronous>, transform_indices = @transform_3, window_bounds = array<i64: 256, 128>}, {pipeline_mode = #tpu.pipeline_mode<synchronous>, transform_indices = @transform_4, window_bounds = array<i64: 1, 128>}, {pipeline_mode = #tpu.pipeline_mode<synchronous>, transform_indices = @transform_5, window_bounds = array<i64: 1, 128>}, {transform_indices = @transform_6, window_bounds = array<i64: 1, 1>}, {transform_indices = @transform_7, window_bounds = array<i64: 16, 1>}]} {
    %c0 = arith.constant 0 : index
    %c0_0 = arith.constant 0 : index
    %0 = vector.load %arg1[%c0, %c0_0] : memref<16x1024xbf16, #tpu.memory_space<vmem>>, vector<16x1024xbf16>
    %c0_1 = arith.constant 0 : index
    %c0_2 = arith.constant 0 : index
    %1 = vector.load %arg2[%c0_1, %c0_2] : memref<1024x256xbf16, #tpu.memory_space<vmem>>, vector<1024x256xbf16>
    %cst = arith.constant dense<0.000000e+00> : vector<16x256xf32>
    %2 = tpu.matmul %0, %1, %cst {dimension_numbers = #tpu.dot_dimension_numbers<[1], [0], [0], [1], [0, 0, 1, 1], [], []>} : vector<16x1024xbf16>, vector<1024x256xbf16>, vector<16x256xf32> -> vector<16x256xf32>
    %c0_3 = arith.constant 0 : index
    %c0_4 = arith.constant 0 : index
    %3 = vector.load %arg3[%c0_3, %c0_4] : memref<1x256xf32, #tpu.memory_space<vmem>>, vector<1x256xf32>
    %4 = vector.broadcast %3 : vector<1x256xf32> to vector<16x256xf32>
    %5 = arith.addf %2, %4 : vector<16x256xf32>
    %cst_5 = arith.constant 0.000000e+00 : f32
    %6 = vector.broadcast %cst_5 : f32 to vector<16x256xf32>
    %7 = arith.maximumf %5, %6 : vector<16x256xf32>
    %8 = arith.truncf %7 : vector<16x256xf32> to vector<16x256xbf16>
    %c0_6 = arith.constant 0 : index
    %c0_7 = arith.constant 0 : index
    %9 = vector.load %arg4[%c0_6, %c0_7] : memref<256x128xbf16, #tpu.memory_space<vmem>>, vector<256x128xbf16>
    %cst_8 = arith.constant dense<0.000000e+00> : vector<16x128xf32>
    %10 = tpu.matmul %8, %9, %cst_8 {dimension_numbers = #tpu.dot_dimension_numbers<[1], [0], [0], [1], [0, 0, 1, 1], [], []>} : vector<16x256xbf16>, vector<256x128xbf16>, vector<16x128xf32> -> vector<16x128xf32>
    %c0_9 = arith.constant 0 : index
    %c0_10 = arith.constant 0 : index
    %11 = vector.load %arg5[%c0_9, %c0_10] : memref<1x128xf32, #tpu.memory_space<vmem>>, vector<1x128xf32>
    %12 = vector.broadcast %11 : vector<1x128xf32> to vector<16x128xf32>
    %13 = arith.addf %10, %12 : vector<16x128xf32>
    %cst_11 = arith.constant 0.000000e+00 : f32
    %14 = vector.broadcast %cst_11 : f32 to vector<16x128xf32>
    %15 = arith.maximumf %13, %14 : vector<16x128xf32>
    %c0_12 = arith.constant 0 : index
    %c0_13 = arith.constant 0 : index
    %16 = vector.load %arg6[%c0_12, %c0_13] : memref<1x128xf32, #tpu.memory_space<vmem>>, vector<1x128xf32>
    %17 = vector.broadcast %16 : vector<1x128xf32> to vector<16x128xf32>
    %18 = arith.mulf %15, %17 : vector<16x128xf32>
    %cst_14 = arith.constant dense<0.000000e+00> : vector<16xf32>
    %19 = vector.multi_reduction <add>, %18, %cst_14 [1] : vector<16x128xf32> to vector<16xf32>
    %20 = vector.shape_cast %19 : vector<16xf32> to vector<16x1xf32>
    %c0_15 = arith.constant 0 : index
    %c0_16 = arith.constant 0 : index
    %21 = memref.load %arg7[%c0_15, %c0_16] : memref<1x1xf32, #tpu.memory_space<smem>>
    %22 = vector.broadcast %21 : f32 to vector<16x1xf32>
    %23 = arith.addf %20, %22 : vector<16x1xf32>
    %c0_17 = arith.constant 0 : index
    %c0_18 = arith.constant 0 : index
    %24 = vector.load %arg8[%c0_17, %c0_18] : memref<16x1xf32, #tpu.memory_space<vmem>>, vector<16x1xf32>
    tpu.vector_store %arg8[%c0_17, %c0_18], %23 {strides = array<i32>} : memref<16x1xf32, #tpu.memory_space<vmem>>, vector<16x1xf32>,
    return
  }
  func.func @transform_0(%arg0: i32) -> (i32, i32) {
    %c0_i32 = arith.constant 0 : i32
    %c0_i32_0 = arith.constant 0 : i32
    return %arg0, %c0_i32 : i32, i32
  }
  func.func @transform_1(%arg0: i32) -> (i32, i32) {
    %c0_i32 = arith.constant 0 : i32
    %c0_i32_0 = arith.constant 0 : i32
    %c0_i32_1 = arith.constant 0 : i32
    return %c0_i32, %c0_i32_0 : i32, i32
  }
  func.func @transform_2(%arg0: i32) -> (i32, i32) {
    %c0_i32 = arith.constant 0 : i32
    %c0_i32_0 = arith.constant 0 : i32
    %c0_i32_1 = arith.constant 0 : i32
    return %c0_i32, %c0_i32_0 : i32, i32
  }
  func.func @transform_3(%arg0: i32) -> (i32, i32) {
    %c0_i32 = arith.constant 0 : i32
    %c0_i32_0 = arith.constant 0 : i32
    %c0_i32_1 = arith.constant 0 : i32
    return %c0_i32, %c0_i32_0 : i32, i32
  }
  func.func @transform_4(%arg0: i32) -> (i32, i32) {
    %c0_i32 = arith.constant 0 : i32
    %c0_i32_0 = arith.constant 0 : i32
    %c0_i32_1 = arith.constant 0 : i32
    return %c0_i32, %c0_i32_0 : i32, i32
  }
  func.func @transform_5(%arg0: i32) -> (i32, i32) {
    %c0_i32 = arith.constant 0 : i32
    %c0_i32_0 = arith.constant 0 : i32
    %c0_i32_1 = arith.constant 0 : i32
    return %c0_i32, %c0_i32_0 : i32, i32
  }
  func.func @transform_6(%arg0: i32) -> (i32, i32) {
    %c0_i32 = arith.constant 0 : i32
    %c0_i32_0 = arith.constant 0 : i32
    %c0_i32_1 = arith.constant 0 : i32
    return %c0_i32, %c0_i32_0 : i32, i32
  }
  func.func @transform_7(%arg0: i32) -> (i32, i32) {
    %c0_i32 = arith.constant 0 : i32
    %c0_i32_0 = arith.constant 0 : i32
    return %arg0, %c0_i32 : i32, i32
  }
}

</mosaic_0001>

<bundles_post_ra>
// kernel: tpu_custom_call.1
= control target key start
LH: loop header
LB: loop body
LE: loop exit
PB: predicated region body
PF: predicated region fallthrough
CT: control target
= control target key end

     0   :  { %13 = vsyncpa [#allocation4], 0  ;;  %s2270_s0 = inlined_call_operand.hbm [shape: bf16[16,1024], index: 0, kind: input, shape index: {}]   ;;  %s2271_s1 = inlined_call_operand.hbm [shape: bf16[1024,256], index: 1, kind: input, shape index: {}]   ;;  %s2272_s2 = inlined_call_operand.vmem [shape: f32[1,256], index: 2, kind: input, shape index: {}]   ;;  %s2273_s3 = inlined_call_operand.hbm [shape: bf16[256,128], index: 3, kind: input, shape index: {}]   ;;  %s2274_s4 = inlined_call_operand.vmem [shape: f32[1,128], index: 4, kind: input, shape index: {}]   ;;  %s2275_s5 = inlined_call_operand.vmem [shape: f32[1,128], index: 5, kind: input, shape index: {}]   ;;  %s2276_s6 = inlined_call_operand.<no memory space> [shape: f32[1,1], index: 6, kind: input, shape index: {}]   ;;  %s2277_s7 = inlined_call_operand.vmem [shape: f32[16,1], index: 7, kind: output, shape index: {}]  }
   0x1   :  { %14 = vsyncpa [#allocation6], 0  ;;  %s32_s26 = sshll.u32 %s2271_s1, 4  ;;  %s2158_s27 = smov [#allocation5]   ;;  %s33_s26 = int_to_ptr.hbm [resolvable:$true] %s32_s26 }
   0x2   :  { %s34_s28 = sshll.u32 %s2158_s27, 4  ;;  %s19_s8 = sshll.u32 %s2270_s0, 4  ;;  %s35_s28 = int_to_ptr.vmem [resolvable:$true] %s34_s28  ;;  %s20_s8 = int_to_ptr.hbm [resolvable:$true] %s19_s8 }
   0x3   :  { %s2159_s9 = smov 128   ;;  %s2160_s10 = smov 8  }
   0x4   :  { %40 = dma.hbm_to_vmem [thread:$0]  %s33_s26, 16384, %s35_s28, [#allocation6], %s2159_s9, %s2159_s9, %s2160_s10  }
   0x5   :  { %s2161_s11 = smov [#allocation3]   ;;  %s2162_s13 = smov 512  }
   0x6   :  { %s21_s12 = sshll.u32 %s2161_s11, 4  ;;  %s2163_s14 = smov 32   ;;  %s22_s12 = int_to_ptr.vmem [resolvable:$true] %s21_s12 }
   0x7   :  { %27 = dma.hbm_to_vmem [thread:$0]  %s20_s8, 1024, %s22_s12, [#allocation4], %s2162_s13, %s2162_s13, %s2163_s14  }
   0x8   :  { %s47_s16 = sshll.u32 %s2273_s3, 4  ;;  %s2164_s17 = smov [#allocation7]   ;;  %s48_s16 = int_to_ptr.hbm [resolvable:$true] %s47_s16 }
   0x9   :  { %s49_s18 = sshll.u32 %s2164_s17, 4  ;;  %s2165_s19 = smov 64   ;;  %s50_s18 = int_to_ptr.vmem [resolvable:$true] %s49_s18 }
   0xa   :  { %s2166_s0 = smov 4  }
   0xb   :  { %55 = dma.hbm_to_vmem [thread:$0]  %s48_s16, 2048, %s50_s18, [#allocation6], %s2165_s19, %s2165_s19, %s2166_s0  }
   0xc   :  { %2154 = dma.done.wait [#allocation4], 1024  }
   0xd   :  { %2155 = vsyncadd [#allocation4], 4294966272 }
   0xe   :  { %2156 = dma.done.wait [#allocation6], 18432  }
   0xf   :  { %2157 = vsyncadd [#allocation6], 4294948864  ;;  %v1401_v0 = vld [vmem:[#allocation5 + $0x70] sm:$0xf]  ;;  %v1942_v1 = vld [vmem:[#allocation5 + $0x74] sm:$0xf0] }
  0x10   :  { %v1465_v2 = vld [vmem:[#allocation5 + $0xf0] sm:$0xf]  ;;  %v1402_v3 = vor.u32 %v1942_v1, %v1401_v0  ;;  %v1958_v4 = vld [vmem:[#allocation5 + $0xf4] sm:$0xf0]  ;;  %v1393_v11 = vld [vmem:[#allocation5 + $0x60] sm:$0xf] }
  0x11   :  { %v1529_v5 = vld [vmem:[#allocation5 + $0x170] sm:$0xf]  ;;  %v1974_v6 = vld [vmem:[#allocation5 + $0x174] sm:$0xf0]  ;;  %v1466_v7 = vor.u32 %v1958_v4, %v1465_v2  ;;  %v1940_v13 = vld [vmem:[#allocation5 + $0x64] sm:$0xf0] }
  0x12   :  { %v1530_v8 = vor.u32 %v1974_v6, %v1529_v5  ;;  %v1593_v9 = vld [vmem:[#allocation5 + $0x1f0] sm:$0xf]  ;;  %v1990_v10 = vld [vmem:[#allocation5 + $0x1f4] sm:$0xf0]  ;;  %896 = vmatpush.bf16.msra.mxu0 %v1402_v3  ;;  %v1457_v14 = vld [vmem:[#allocation5 + $0xe0] sm:$0xf]  ;;  %v1394_v16 = vor.u32 %v1940_v13, %v1393_v11 }
  0x13   :  { %v1594_v12 = vor.u32 %v1990_v10, %v1593_v9  ;;  %v1956_v15 = vld [vmem:[#allocation5 + $0xe4] sm:$0xf0]  ;;  %910 = vmatpush.bf16.msra.mxu1 %v1466_v7  ;;  %v1521_v18 = vld [vmem:[#allocation5 + $0x160] sm:$0xf]  ;;  %v1385_v23 = vld [vmem:[#allocation5 + $0x50] sm:$0xf] }
  0x14   :  { %924 = vmatpush.bf16.msra.mxu2 %v1530_v8  ;;  %v1458_v17 = vor.u32 %v1956_v15, %v1457_v14  ;;  %v1972_v19 = vld [vmem:[#allocation5 + $0x164] sm:$0xf0]  ;;  %v1585_v20 = vld [vmem:[#allocation5 + $0x1e0] sm:$0xf]  ;;  %v1938_v24 = vld [vmem:[#allocation5 + $0x54] sm:$0xf0] }
  0x15   :  { %938 = vmatpush.bf16.msra.mxu3 %v1594_v12  ;;  %v1522_v21 = vor.u32 %v1972_v19, %v1521_v18  ;;  %v1988_v22 = vld [vmem:[#allocation5 + $0x1e4] sm:$0xf0]  ;;  %v1449_v26 = vld [vmem:[#allocation5 + $0xd0] sm:$0xf]  ;;  %v1954_v27 = vld [vmem:[#allocation5 + $0xd4] sm:$0xf0]  ;;  %v1386_v29 = vor.u32 %v1938_v24, %v1385_v23 }
  0x16   :  { %v1586_v25 = vor.u32 %v1988_v22, %v1585_v20  ;;  %v1513_v28 = vld [vmem:[#allocation5 + $0x150] sm:$0xf]  ;;  %897 = vmatpush.bf16.msra.mxu0 %v1394_v16  ;;  %v1970_v30 = vld [vmem:[#allocation5 + $0x154] sm:$0xf0]  ;;  %v1450_v33 = vor.u32 %v1954_v27, %v1449_v26  ;;  %v1377_v35 = vld [vmem:[#allocation5 + $0x40] sm:$0xf] }
  0x17   :  { %v1577_v31 = vld [vmem:[#allocation5 + $0x1d0] sm:$0xf]  ;;  %v1986_v32 = vld [vmem:[#allocation5 + $0x1d4] sm:$0xf0]  ;;  %911 = vmatpush.bf16.msra.mxu1 %v1458_v17  ;;  %v1514_v34 = vor.u32 %v1970_v30, %v1513_v28  ;;  %v1936_v36 = vld [vmem:[#allocation5 + $0x44] sm:$0xf0] }
  0x18   :  { %925 = vmatpush.bf16.msra.mxu2 %v1522_v21  ;;  %v1441_v37 = vld [vmem:[#allocation5 + $0xc0] sm:$0xf]  ;;  %v1578_v38 = vor.u32 %v1986_v32, %v1577_v31  ;;  %v1952_v39 = vld [vmem:[#allocation5 + $0xc4] sm:$0xf0]  ;;  %v1378_v44 = vor.u32 %v1936_v36, %v1377_v35  ;;  %v1369_v47 = vld [vmem:[#allocation5 + $0x30] sm:$0xf] }
  0x19   :  { %939 = vmatpush.bf16.msra.mxu3 %v1586_v25  ;;  %v1505_v40 = vld [vmem:[#allocation5 + $0x140] sm:$0xf]  ;;  %v1968_v41 = vld [vmem:[#allocation5 + $0x144] sm:$0xf0]  ;;  %v1442_v45 = vor.u32 %v1952_v39, %v1441_v37  ;;  %v1934_v48 = vld [vmem:[#allocation5 + $0x34] sm:$0xf0] }
  0x1a   :  { %v1569_v42 = vld [vmem:[#allocation5 + $0x1c0] sm:$0xf]  ;;  %v1984_v43 = vld [vmem:[#allocation5 + $0x1c4] sm:$0xf0]  ;;  %898 = vmatpush.bf16.msra.mxu0 %v1386_v29  ;;  %v1506_v46 = vor.u32 %v1968_v41, %v1505_v40  ;;  %v1433_v49 = vld [vmem:[#allocation5 + $0xb0] sm:$0xf]  ;;  %v1370_v56 = vor.u32 %v1934_v48, %v1369_v47 }
  0x1b   :  { %912 = vmatpush.bf16.msra.mxu1 %v1450_v33  ;;  %v1570_v50 = vor.u32 %v1984_v43, %v1569_v42  ;;  %v1950_v51 = vld [vmem:[#allocation5 + $0xb4] sm:$0xf0]  ;;  %v1497_v52 = vld [vmem:[#allocation5 + $0x130] sm:$0xf]  ;;  %v1361_v59 = vld [vmem:[#allocation5 + $0x20] sm:$0xf] }
  0x1c   :  { %926 = vmatpush.bf16.msra.mxu2 %v1514_v34  ;;  %v1966_v53 = vld [vmem:[#allocation5 + $0x134] sm:$0xf0]  ;;  %v1561_v54 = vld [vmem:[#allocation5 + $0x1b0] sm:$0xf]  ;;  %v1434_v57 = vor.u32 %v1950_v51, %v1433_v49  ;;  %v1932_v60 = vld [vmem:[#allocation5 + $0x24] sm:$0xf0] }
  0x1d   :  { %940 = vmatpush.bf16.msra.mxu3 %v1578_v38  ;;  %v1982_v55 = vld [vmem:[#allocation5 + $0x1b4] sm:$0xf0]  ;;  %v1498_v58 = vor.u32 %v1966_v53, %v1497_v52  ;;  %v1425_v61 = vld [vmem:[#allocation5 + $0xa0] sm:$0xf]  ;;  %v1948_v63 = vld [vmem:[#allocation5 + $0xa4] sm:$0xf0]  ;;  %v1362_v4 = vor.u32 %v1932_v60, %v1361_v59 }
  0x1e   :  { %899 = vmatpush.bf16.msra.mxu0 %v1378_v44  ;;  %v1562_v62 = vor.u32 %v1982_v55, %v1561_v54  ;;  %v1489_v0 = vld [vmem:[#allocation5 + $0x120] sm:$0xf]  ;;  %v1964_v1 = vld [vmem:[#allocation5 + $0x124] sm:$0xf0]  ;;  %v1426_v5 = vor.u32 %v1948_v63, %v1425_v61  ;;  %v1353_v7 = vld [vmem:[#allocation5 + $0x10] sm:$0xf] }
  0x1f   :  { %913 = vmatpush.bf16.msra.mxu1 %v1442_v45  ;;  %v1553_v2 = vld [vmem:[#allocation5 + $0x1a0] sm:$0xf]  ;;  %v1980_v3 = vld [vmem:[#allocation5 + $0x1a4] sm:$0xf0]  ;;  %v1490_v6 = vor.u32 %v1964_v1, %v1489_v0  ;;  %v1930_v8 = vld [vmem:[#allocation5 + $0x14] sm:$0xf0] }
  0x20   :  { %927 = vmatpush.bf16.msra.mxu2 %v1506_v46  ;;  %v1417_v9 = vld [vmem:[#allocation5 + $0x90] sm:$0xf]  ;;  %v1554_v10 = vor.u32 %v1980_v3, %v1553_v2  ;;  %v1946_v11 = vld [vmem:[#allocation5 + $0x94] sm:$0xf0]  ;;  %v1354_v16 = vor.u32 %v1930_v8, %v1353_v7  ;;  %v1345_v17 = vld [vmem:[#allocation5] sm:$0xf] }
  0x21   :  { %941 = vmatpush.bf16.msra.mxu3 %v1570_v50  ;;  %v1481_v12 = vld [vmem:[#allocation5 + $0x110] sm:$0xf]  ;;  %v1962_v13 = vld [vmem:[#allocation5 + $0x114] sm:$0xf0]  ;;  %v1928_v18 = vld [vmem:[#allocation5 + $0x4] sm:$0xf0]  ;;  %v1418_v19 = vor.u32 %v1946_v11, %v1417_v9 }
  0x22   :  { %900 = vmatpush.bf16.msra.mxu0 %v1370_v56  ;;  %v1545_v14 = vld [vmem:[#allocation5 + $0x190] sm:$0xf]  ;;  %v1978_v15 = vld [vmem:[#allocation5 + $0x194] sm:$0xf0]  ;;  %v1482_v20 = vor.u32 %v1962_v13, %v1481_v12  ;;  %v1409_v21 = vld [vmem:[#allocation5 + $0x80] sm:$0xf]  ;;  %v1346_v31 = vor.u32 %v1928_v18, %v1345_v17 }
  0x23   :  { %914 = vmatpush.bf16.msra.mxu1 %v1434_v57  ;;  %v1944_v22 = vld [vmem:[#allocation5 + $0x84] sm:$0xf0]  ;;  %v1473_v23 = vld [vmem:[#allocation5 + $0x100] sm:$0xf]  ;;  %v1546_v24 = vor.u32 %v1978_v15, %v1545_v14  ;;  %v1657_v28 = vld [vmem:[#allocation5 + $0x270] sm:$0xf] }
  0x24   :  { %928 = vmatpush.bf16.msra.mxu2 %v1498_v58  ;;  %v1960_v25 = vld [vmem:[#allocation5 + $0x104] sm:$0xf0]  ;;  %v1537_v26 = vld [vmem:[#allocation5 + $0x180] sm:$0xf]  ;;  %v2006_v29 = vld [vmem:[#allocation5 + $0x274] sm:$0xf0]  ;;  %v1410_v35 = vor.u32 %v1944_v22, %v1409_v21 }
  0x25   :  { %942 = vmatpush.bf16.msra.mxu3 %v1562_v62  ;;  %v1976_v27 = vld [vmem:[#allocation5 + $0x184] sm:$0xf0]  ;;  %v1721_v30 = vld [vmem:[#allocation5 + $0x2f0] sm:$0xf]  ;;  %v2022_v32 = vld [vmem:[#allocation5 + $0x2f4] sm:$0xf0]  ;;  %v1474_v36 = vor.u32 %v1960_v25, %v1473_v23  ;;  %v1658_v40 = vor.u32 %v2006_v29, %v1657_v28 }
  0x26   :  { %901 = vmatpush.bf16.msra.mxu0 %v1362_v4  ;;  %v1785_v33 = vld [vmem:[#allocation5 + $0x370] sm:$0xf]  ;;  %v2038_v34 = vld [vmem:[#allocation5 + $0x374] sm:$0xf0]  ;;  %v1538_v39 = vor.u32 %v1976_v27, %v1537_v26  ;;  %v1649_v41 = vld [vmem:[#allocation5 + $0x260] sm:$0xf]  ;;  %v1722_v43 = vor.u32 %v2022_v32, %v1721_v30 }
  0x27   :  { %915 = vmatpush.bf16.msra.mxu1 %v1426_v5  ;;  %v1849_v37 = vld [vmem:[#allocation5 + $0x3f0] sm:$0xf]  ;;  %v2054_v38 = vld [vmem:[#allocation5 + $0x3f4] sm:$0xf0]  ;;  %v2004_v42 = vld [vmem:[#allocation5 + $0x264] sm:$0xf0]  ;;  %v1786_v44 = vor.u32 %v2038_v34, %v1785_v33 }
  0x28   :  { %929 = vmatpush.bf16.msra.mxu2 %v1490_v6  ;;  %v1713_v45 = vld [vmem:[#allocation5 + $0x2e0] sm:$0xf]  ;;  %v2020_v46 = vld [vmem:[#allocation5 + $0x2e4] sm:$0xf0]  ;;  %v1850_v48 = vor.u32 %v2054_v38, %v1849_v37  ;;  %v1650_v55 = vor.u32 %v2004_v42, %v1649_v41  ;;  %v1641_v56 = vld [vmem:[#allocation5 + $0x250] sm:$0xf] }
  0x29   :  { %943 = vmatpush.bf16.msra.mxu3 %v1554_v10  ;;  %v1777_v47 = vld [vmem:[#allocation5 + $0x360] sm:$0xf]  ;;  %v2036_v49 = vld [vmem:[#allocation5 + $0x364] sm:$0xf0]  ;;  %v2002_v57 = vld [vmem:[#allocation5 + $0x254] sm:$0xf0]  ;;  %v1714_v60 = vor.u32 %v2020_v46, %v1713_v45 }
  0x2a   :  { %902 = vmatpush.bf16.msra.mxu0 %v1354_v16  ;;  %v1841_v50 = vld [vmem:[#allocation5 + $0x3e0] sm:$0xf]  ;;  %v2052_v51 = vld [vmem:[#allocation5 + $0x3e4] sm:$0xf0]  ;;  %v1778_v61 = vor.u32 %v2036_v49, %v1777_v47  ;;  %v1705_v62 = vld [vmem:[#allocation5 + $0x2d0] sm:$0xf]  ;;  %v1642_v9 = vor.u32 %v2002_v57, %v1641_v56 }
  0x2b   :  { %916 = vmatpush.bf16.msra.mxu1 %v1418_v19  ;;  %v1313_v52 = vld [vmem:[#allocation3] sm:$0xf]  ;;  %v1321_v54 = vld [vmem:[#allocation3 + $0x8] sm:$0xf]  ;;  %v2018_v63 = vld [vmem:[#allocation5 + $0x2d4] sm:$0xf0]  ;;  %v1842_v2 = vor.u32 %v2052_v51, %v1841_v50 }
  0x2c   :  { %930 = vmatpush.bf16.msra.mxu2 %v1482_v20  ;;  %v1923_v53 = vld [vmem:[#allocation3 + $0x1c] sm:$0xf0]  ;;  %v1924_v59 = vld [vmem:[#allocation3 + $0x24] sm:$0xf0]  ;;  %v1769_v0 = vld [vmem:[#allocation5 + $0x350] sm:$0xf]  ;;  %v1706_v12 = vor.u32 %v2018_v63, %v1705_v62 }
  0x2d   :  { %944 = vmatpush.bf16.msra.mxu3 %v1546_v24  ;;  %v2216_v58 = vor.u32 %v1923_v53, %v1313_v52  ;;  %v2218_v1 = vor.u32 %v1924_v59, %v1321_v54  ;;  %v2034_v3 = vld [vmem:[#allocation5 + $0x354] sm:$0xf0]  ;;  %v1833_v4 = vld [vmem:[#allocation5 + $0x3d0] sm:$0xf]  ;;  %v1919_v6 = vld [vmem:[#allocation3 + $0x4] sm:$0xf] }
  0x2e   :  { %903 = vmatpush.bf16.msra.mxu0 %v1346_v31  ;;  %v2050_v5 = vld [vmem:[#allocation5 + $0x3d4] sm:$0xf0]  ;;  %v1315_v7 = vld [vmem:[#allocation3 + $0x20] sm:$0xf0]  ;;  %v1920_v8 = vld [vmem:[#allocation3 + $0xc] sm:$0xf]  ;;  %v1770_v13 = vor.u32 %v2034_v3, %v1769_v0 }
  0x2f   :  { %917 = vmatpush.bf16.msra.mxu1 %v1410_v35  ;;  %v2222_v10 = vor.u32 %v1919_v6, %v1315_v7  ;;  %v1323_v11 = vld [vmem:[#allocation3 + $0x28] sm:$0xf0]  ;;  %v1633_v14 = vld [vmem:[#allocation5 + $0x240] sm:$0xf]  ;;  %v2000_v15 = vld [vmem:[#allocation5 + $0x244] sm:$0xf0]  ;;  %v1834_v18 = vor.u32 %v2050_v5, %v1833_v4 }
  0x30   :  { %931 = vmatpush.bf16.msra.mxu2 %v1474_v36  ;;  %v1697_v16 = vld [vmem:[#allocation5 + $0x2c0] sm:$0xf]  ;;  %v2224_v17 = vor.u32 %v1920_v8, %v1323_v11  ;;  %v2016_v19 = vld [vmem:[#allocation5 + $0x2c4] sm:$0xf0]  ;;  %v1634_v24 = vor.u32 %v2000_v15, %v1633_v14  ;;  %v1625_v27 = vld [vmem:[#allocation5 + $0x230] sm:$0xf] }
  0x31   :  { %945 = vmatpush.bf16.msra.mxu3 %v1538_v39  ;;  %904 = vmatmul.bf16.vlgmr.msra.gmra.mxu0 %v2216_v58  ;;  %v1761_v20 = vld [vmem:[#allocation5 + $0x340] sm:$0xf]  ;;  %v2032_v21 = vld [vmem:[#allocation5 + $0x344] sm:$0xf0]  ;;  %v1698_v25 = vor.u32 %v2016_v19, %v1697_v16  ;;  %v1998_v28 = vld [vmem:[#allocation5 + $0x234] sm:$0xf0] }
  0x32   :  { %952 = vmatpush.bf16.msrb.mxu0 %v1658_v40  ;;  %918 = vmatmul.bf16.vlgmr.msra.gmra.mxu1 %v2222_v10  ;;  %v1825_v22 = vld [vmem:[#allocation5 + $0x3c0] sm:$0xf]  ;;  %v2048_v23 = vld [vmem:[#allocation5 + $0x3c4] sm:$0xf0]  ;;  %v1762_v26 = vor.u32 %v2032_v21, %v1761_v20  ;;  %v1689_v29 = vld [vmem:[#allocation5 + $0x2b0] sm:$0xf]  ;;  %v1626_v36 = vor.u32 %v1998_v28, %v1625_v27 }
  0x33   :  { %966 = vmatpush.bf16.msrb.mxu1 %v1722_v43  ;;  %932 = vmatmul.bf16.vlgmr.msra.gmra.mxu2 %v2218_v1  ;;  %v1826_v30 = vor.u32 %v2048_v23, %v1825_v22  ;;  %v2014_v31 = vld [vmem:[#allocation5 + $0x2b4] sm:$0xf0]  ;;  %v1753_v32 = vld [vmem:[#allocation5 + $0x330] sm:$0xf]  ;;  %v1617_v39 = vld [vmem:[#allocation5 + $0x220] sm:$0xf] }
  0x34   :  { %980 = vmatpush.bf16.msrb.mxu2 %v1786_v44  ;;  %946 = vmatmul.bf16.vlgmr.msra.gmra.mxu3 %v2224_v17  ;;  %v2030_v33 = vld [vmem:[#allocation5 + $0x334] sm:$0xf0]  ;;  %v1817_v34 = vld [vmem:[#allocation5 + $0x3b0] sm:$0xf]  ;;  %v1690_v37 = vor.u32 %v2014_v31, %v1689_v29  ;;  %v1996_v40 = vld [vmem:[#allocation5 + $0x224] sm:$0xf0] }
  0x35   :  { %994 = vmatpush.bf16.msrb.mxu3 %v1850_v48  ;;  %v2046_v35 = vld [vmem:[#allocation5 + $0x3b4] sm:$0xf0]  ;;  %v1754_v38 = vor.u32 %v2030_v33, %v1753_v32  ;;  %v1681_v41 = vld [vmem:[#allocation5 + $0x2a0] sm:$0xf]  ;;  %v2012_v43 = vld [vmem:[#allocation5 + $0x2a4] sm:$0xf0]  ;;  %v1618_v48 = vor.u32 %v1996_v40, %v1617_v39 }
  0x36   :  { %953 = vmatpush.bf16.msrb.mxu0 %v1650_v55  ;;  %v1818_v42 = vor.u32 %v2046_v35, %v1817_v34  ;;  %v1745_v44 = vld [vmem:[#allocation5 + $0x320] sm:$0xf]  ;;  %v2028_v45 = vld [vmem:[#allocation5 + $0x324] sm:$0xf0]  ;;  %v1609_v49 = vld [vmem:[#allocation5 + $0x210] sm:$0xf]  ;;  %v1682_v50 = vor.u32 %v2012_v43, %v1681_v41 }
  0x37   :  { %967 = vmatpush.bf16.msrb.mxu1 %v1714_v60  ;;  %v1809_v46 = vld [vmem:[#allocation5 + $0x3a0] sm:$0xf]  ;;  %v2044_v47 = vld [vmem:[#allocation5 + $0x3a4] sm:$0xf0]  ;;  %v1746_v51 = vor.u32 %v2028_v45, %v1745_v44  ;;  %v1994_v52 = vld [vmem:[#allocation5 + $0x214] sm:$0xf0] }
  0x38   :  { %981 = vmatpush.bf16.msrb.mxu2 %v1778_v61  ;;  %v1673_v53 = vld [vmem:[#allocation5 + $0x290] sm:$0xf]  ;;  %v2010_v54 = vld [vmem:[#allocation5 + $0x294] sm:$0xf0]  ;;  %v1810_v55 = vor.u32 %v2044_v47, %v1809_v46  ;;  %v1601_v61 = vld [vmem:[#allocation5 + $0x200] sm:$0xf]  ;;  %v1610_v63 = vor.u32 %v1994_v52, %v1609_v49 }
  0x39   :  { %995 = vmatpush.bf16.msrb.mxu3 %v1842_v2  ;;  %v1737_v56 = vld [vmem:[#allocation5 + $0x310] sm:$0xf]  ;;  %v2026_v57 = vld [vmem:[#allocation5 + $0x314] sm:$0xf0]  ;;  %v1992_v62 = vld [vmem:[#allocation5 + $0x204] sm:$0xf0]  ;;  %v1674_v5 = vor.u32 %v2010_v54, %v1673_v53 }
  0x3a   :  { %954 = vmatpush.bf16.msrb.mxu0 %v1642_v9  ;;  %v1801_v59 = vld [vmem:[#allocation5 + $0x390] sm:$0xf]  ;;  %v2042_v60 = vld [vmem:[#allocation5 + $0x394] sm:$0xf0]  ;;  %v1665_v0 = vld [vmem:[#allocation5 + $0x280] sm:$0xf]  ;;  %v1738_v6 = vor.u32 %v2026_v57, %v1737_v56  ;;  %v1602_v19 = vor.u32 %v1992_v62, %v1601_v61 }
  0x3b   :  { %968 = vmatpush.bf16.msrb.mxu1 %v1706_v12  ;;  %v2008_v2 = vld [vmem:[#allocation5 + $0x284] sm:$0xf0]  ;;  %v1729_v3 = vld [vmem:[#allocation5 + $0x300] sm:$0xf]  ;;  %v1941_v9 = vld [vmem:[#allocation5 + $0x74] sm:$0xf]  ;;  %v1802_v11 = vor.u32 %v2042_v60, %v1801_v59 }
  0x3c   :  { %982 = vmatpush.bf16.msrb.mxu2 %v1770_v13  ;;  %v2024_v4 = vld [vmem:[#allocation5 + $0x304] sm:$0xf0]  ;;  %v1793_v7 = vld [vmem:[#allocation5 + $0x380] sm:$0xf]  ;;  %v1403_v12 = vld [vmem:[#allocation5 + $0x78] sm:$0xf0]  ;;  %v1666_v23 = vor.u32 %v2008_v2, %v1665_v0 }
  0x3d   :  { %996 = vmatpush.bf16.msrb.mxu3 %v1834_v18  ;;  %v2040_v8 = vld [vmem:[#allocation5 + $0x384] sm:$0xf0]  ;;  %v1957_v13 = vld [vmem:[#allocation5 + $0xf4] sm:$0xf]  ;;  %v1467_v14 = vld [vmem:[#allocation5 + $0xf8] sm:$0xf0]  ;;  %v1406_v29 = vor.u32 %v1941_v9, %v1403_v12 }
  0x3e   :  { %955 = vmatpush.bf16.msrb.mxu0 %v1634_v24  ;;  %v1973_v15 = vld [vmem:[#allocation5 + $0x174] sm:$0xf]  ;;  %v1531_v16 = vld [vmem:[#allocation5 + $0x178] sm:$0xf0]  ;;  %v1329_v21 = vld [vmem:[#allocation3 + $0x10] sm:$0xf]  ;;  %v1730_v24 = vor.u32 %v2024_v4, %v1729_v3  ;;  %v1794_v28 = vor.u32 %v2040_v8, %v1793_v7  ;;  %v1470_v33 = vor.u32 %v1957_v13, %v1467_v14 }
  0x3f   :  { %969 = vmatpush.bf16.msrb.mxu1 %v1698_v25  ;;  %v1989_v18 = vld [vmem:[#allocation5 + $0x1f4] sm:$0xf]  ;;  %v1595_v20 = vld [vmem:[#allocation5 + $0x1f8] sm:$0xf0]  ;;  %v1925_v22 = vld [vmem:[#allocation3 + $0x2c] sm:$0xf0]  ;;  %v1534_v34 = vor.u32 %v1973_v15, %v1531_v16 }
  0x40   :  { %983 = vmatpush.bf16.msrb.mxu2 %v1762_v26  ;;  %v1337_v25 = vld [vmem:[#allocation3 + $0x18] sm:$0xf]  ;;  %v1921_v27 = vld [vmem:[#allocation3 + $0x14] sm:$0xf]  ;;  %v1922_v31 = vld [vmem:[#allocation3 + $0x1c] sm:$0xf]  ;;  %v2228_v39 = vor.u32 %v1925_v22, %v1329_v21 }
  0x41   :  { %997 = vmatpush.bf16.msrb.mxu3 %v1826_v30  ;;  %v1926_v26 = vld [vmem:[#allocation3 + $0x34] sm:$0xf0]  ;;  %v1331_v30 = vld [vmem:[#allocation3 + $0x30] sm:$0xf0]  ;;  %v1339_v32 = vld [vmem:[#allocation3 + $0x38] sm:$0xf0] }
  0x42   :  { %956 = vmatpush.bf16.msrb.mxu0 %v1626_v36  ;;  %v1939_v35 = vld [vmem:[#allocation5 + $0x64] sm:$0xf]  ;;  %v1395_v36 = vld [vmem:[#allocation5 + $0x68] sm:$0xf0]  ;;  %v2230_v43 = vor.u32 %v1926_v26, %v1337_v25  ;;  %v2232_v44 = vor.u32 %v1921_v27, %v1331_v30  ;;  %v2234_v47 = vor.u32 %v1922_v31, %v1339_v32  ;;  %v1387_v52 = vld [vmem:[#allocation5 + $0x58] sm:$0xf0] }
  0x43   :  { %970 = vmatpush.bf16.msrb.mxu1 %v1690_v37  ;;  %v1955_v37 = vld [vmem:[#allocation5 + $0xe4] sm:$0xf]  ;;  %v1459_v40 = vld [vmem:[#allocation5 + $0xe8] sm:$0xf0]  ;;  %v1953_v53 = vld [vmem:[#allocation5 + $0xd4] sm:$0xf] }
  0x44   :  { %984 = vmatpush.bf16.msrb.mxu2 %v1754_v38  ;;  %v1598_v38 = vor.u32 %v1989_v18, %v1595_v20  ;;  %v1971_v41 = vld [vmem:[#allocation5 + $0x164] sm:$0xf]  ;;  %v1587_v46 = vld [vmem:[#allocation5 + $0x1e8] sm:$0xf0]  ;;  %v1462_v49 = vor.u32 %v1955_v37, %v1459_v40  ;;  %v1969_v56 = vld [vmem:[#allocation5 + $0x154] sm:$0xf] }
  0x45   :  { %998 = vmatpush.bf16.msrb.mxu3 %v1818_v42  ;;  %v1523_v42 = vld [vmem:[#allocation5 + $0x168] sm:$0xf0]  ;;  %v1987_v45 = vld [vmem:[#allocation5 + $0x1e4] sm:$0xf]  ;;  %v1515_v57 = vld [vmem:[#allocation5 + $0x158] sm:$0xf0] }
  0x46   :  { %957 = vmatpush.bf16.msrb.mxu0 %v1618_v48  ;;  %v1398_v48 = vor.u32 %v1939_v35, %v1395_v36  ;;  %v1590_v54 = vor.u32 %v1987_v45, %v1587_v46  ;;  %v1985_v59 = vld [vmem:[#allocation5 + $0x1d4] sm:$0xf]  ;;  %v1579_v60 = vld [vmem:[#allocation5 + $0x1d8] sm:$0xf0]  ;;  %v1935_v0 = vld [vmem:[#allocation5 + $0x44] sm:$0xf] }
  0x47   :  { %971 = vmatpush.bf16.msrb.mxu1 %v1682_v50  ;;  %v1526_v50 = vor.u32 %v1971_v41, %v1523_v42  ;;  %v1379_v2 = vld [vmem:[#allocation5 + $0x48] sm:$0xf0]  ;;  %v1951_v3 = vld [vmem:[#allocation5 + $0xc4] sm:$0xf]  ;;  %v1582_v4 = vor.u32 %v1985_v59, %v1579_v60  ;;  %v1933_v14 = vld [vmem:[#allocation5 + $0x34] sm:$0xf] }
  0x48   :  { %985 = vmatpush.bf16.msrb.mxu2 %v1746_v51  ;;  %v1937_v51 = vld [vmem:[#allocation5 + $0x54] sm:$0xf]  ;;  %v1507_v7 = vld [vmem:[#allocation5 + $0x148] sm:$0xf0]  ;;  %v1983_v8 = vld [vmem:[#allocation5 + $0x1c4] sm:$0xf] }
  0x49   :  { %999 = vmatpush.bf16.msrb.mxu3 %v1810_v55  ;;  %v1451_v55 = vld [vmem:[#allocation5 + $0xd8] sm:$0xf0]  ;;  %v1390_v61 = vor.u32 %v1937_v51, %v1387_v52  ;;  %v1571_v9 = vld [vmem:[#allocation5 + $0x1c8] sm:$0xf0]  ;;  %v1949_v16 = vld [vmem:[#allocation5 + $0xb4] sm:$0xf] }
  0x4a   :  { %958 = vmatpush.bf16.msrb.mxu0 %v1610_v63  ;;  %v1454_v62 = vor.u32 %v1953_v53, %v1451_v55  ;;  %v1518_v63 = vor.u32 %v1969_v56, %v1515_v57  ;;  %v1371_v15 = vld [vmem:[#allocation5 + $0x38] sm:$0xf0]  ;;  %v1574_v18 = vor.u32 %v1983_v8, %v1571_v9  ;;  %v1965_v20 = vld [vmem:[#allocation5 + $0x134] sm:$0xf]  ;;  %v1931_v27 = vld [vmem:[#allocation5 + $0x24] sm:$0xf] }
  0x4b   :  { %972 = vmatpush.bf16.msrb.mxu1 %v1674_v5  ;;  %v1443_v5 = vld [vmem:[#allocation5 + $0xc8] sm:$0xf0]  ;;  %v1499_v21 = vld [vmem:[#allocation5 + $0x138] sm:$0xf0]  ;;  %v1981_v22 = vld [vmem:[#allocation5 + $0x1b4] sm:$0xf] }
  0x4c   :  { %986 = vmatpush.bf16.msrb.mxu2 %v1738_v6  ;;  %v1967_v6 = vld [vmem:[#allocation5 + $0x144] sm:$0xf]  ;;  %v1446_v12 = vor.u32 %v1951_v3, %v1443_v5  ;;  %v1502_v26 = vor.u32 %v1965_v20, %v1499_v21  ;;  %v1427_v31 = vld [vmem:[#allocation5 + $0xa8] sm:$0xf0]  ;;  %v1929_v40 = vld [vmem:[#allocation5 + $0x14] sm:$0xf] }
  0x4d   :  { %1000 = vmatpush.bf16.msrb.mxu3 %v1802_v11  ;;  %v1382_v11 = vor.u32 %v1935_v0, %v1379_v2  ;;  %v1510_v13 = vor.u32 %v1967_v6, %v1507_v7  ;;  %v1963_v32 = vld [vmem:[#allocation5 + $0x124] sm:$0xf]  ;;  %v1555_v35 = vld [vmem:[#allocation5 + $0x1a8] sm:$0xf0]  ;;  %v1355_v41 = vld [vmem:[#allocation5 + $0x18] sm:$0xf0] }
  0x4e   :  { %959 = vmatpush.bf16.msrb.mxu0 %v1602_v19  ;;  %v1435_v19 = vld [vmem:[#allocation5 + $0xb8] sm:$0xf0]  ;;  %v1945_v42 = vld [vmem:[#allocation5 + $0x94] sm:$0xf]  ;;  %v1358_v52 = vor.u32 %v1929_v40, %v1355_v41  ;;  %v1927_v53 = vld [vmem:[#allocation5 + $0x4] sm:$0xf] }
  0x4f   :  { %973 = vmatpush.bf16.msrb.mxu1 %v1666_v23  ;;  %v1563_v23 = vld [vmem:[#allocation5 + $0x1b8] sm:$0xf0]  ;;  %v1438_v25 = vor.u32 %v1949_v16, %v1435_v19  ;;  %v1943_v57 = vld [vmem:[#allocation5 + $0x84] sm:$0xf]  ;;  %v1411_v59 = vld [vmem:[#allocation5 + $0x88] sm:$0xf0] }
  0x50   :  { %987 = vmatpush.bf16.msrb.mxu2 %v1730_v24  ;;  %v1374_v24 = vor.u32 %v1933_v14, %v1371_v15  ;;  %v1566_v30 = vor.u32 %v1981_v22, %v1563_v23  ;;  %v1419_v46 = vld [vmem:[#allocation5 + $0x98] sm:$0xf0]  ;;  %v1959_v60 = vld [vmem:[#allocation5 + $0x104] sm:$0xf]  ;;  %v1539_v0 = vld [vmem:[#allocation5 + $0x188] sm:$0xf0]  ;;  %v1414_v9 = vor.u32 %v1943_v57, %v1411_v59 }
  0x51   :  { %1001 = vmatpush.bf16.msrb.mxu3 %v1794_v28  ;;  %960 = vmatmul.bf16.vlgmr.msrb.gmra.mxu0 %v2228_v39  ;;  %v1363_v28 = vld [vmem:[#allocation5 + $0x28] sm:$0xf0]  ;;  %v1547_v51 = vld [vmem:[#allocation5 + $0x198] sm:$0xf0]  ;;  %v1422_v55 = vor.u32 %v1945_v42, %v1419_v46  ;;  %v2005_v2 = vld [vmem:[#allocation5 + $0x274] sm:$0xf] }
  0x52   :  { %1008 = vmatpush.bf16.msra.mxu0 %v1406_v29  ;;  %974 = vmatmul.bf16.vlgmr.msrb.gmra.mxu1 %v2232_v44  ;;  %v1947_v29 = vld [vmem:[#allocation5 + $0xa4] sm:$0xf]  ;;  %v1366_v36 = vor.u32 %v1931_v27, %v1363_v28  ;;  %v1659_v3 = vld [vmem:[#allocation5 + $0x278] sm:$0xf0]  ;;  %v2037_v7 = vld [vmem:[#allocation5 + $0x374] sm:$0xf] }
  0x53   :  { %1022 = vmatpush.bf16.msra.mxu1 %v1470_v33  ;;  %988 = vmatmul.bf16.vlgmr.msrb.gmra.mxu2 %v2230_v43  ;;  %v1491_v33 = vld [vmem:[#allocation5 + $0x128] sm:$0xf0]  ;;  %v1430_v37 = vor.u32 %v1947_v29, %v1427_v31  ;;  %v1723_v6 = vld [vmem:[#allocation5 + $0x2f8] sm:$0xf0]  ;;  %v1662_v15 = vor.u32 %v2005_v2, %v1659_v3  ;;  %v2003_v16 = vld [vmem:[#allocation5 + $0x264] sm:$0xf] }
  0x54   :  { %1036 = vmatpush.bf16.msra.mxu2 %v1534_v34  ;;  %1002 = vmatmul.bf16.vlgmr.msrb.gmra.mxu3 %v2234_v47  ;;  %v1979_v34 = vld [vmem:[#allocation5 + $0x1a4] sm:$0xf]  ;;  %v1787_v8 = vld [vmem:[#allocation5 + $0x378] sm:$0xf0]  ;;  %v1715_v22 = vld [vmem:[#allocation5 + $0x2e8] sm:$0xf0] }
  0x55   :  { %1050 = vmatpush.bf16.msra.mxu3 %v1598_v38  ;;  %v1494_v38 = vor.u32 %v1963_v32, %v1491_v33  ;;  %v1558_v45 = vor.u32 %v1979_v34, %v1555_v35  ;;  %v1790_v20 = vor.u32 %v2037_v7, %v1787_v8  ;;  %v2019_v21 = vld [vmem:[#allocation5 + $0x2e4] sm:$0xf]  ;;  %v1843_v27 = vld [vmem:[#allocation5 + $0x3e8] sm:$0xf0]  ;;  %v2001_v31 = vld [vmem:[#allocation5 + $0x254] sm:$0xf] }
  0x56   :  { %1009 = vmatpush.bf16.msra.mxu0 %v1398_v48  ;;  %v1961_v48 = vld [vmem:[#allocation5 + $0x114] sm:$0xf]  ;;  %v1718_v29 = vor.u32 %v2019_v21, %v1715_v22  ;;  %v1643_v32 = vld [vmem:[#allocation5 + $0x258] sm:$0xf0]  ;;  %v1999_v46 = vld [vmem:[#allocation5 + $0x244] sm:$0xf] }
  0x57   :  { %1023 = vmatpush.bf16.msra.mxu1 %v1462_v49  ;;  %v1483_v49 = vld [vmem:[#allocation5 + $0x118] sm:$0xf0]  ;;  %v2017_v33 = vld [vmem:[#allocation5 + $0x2d4] sm:$0xf]  ;;  %v1646_v41 = vor.u32 %v2001_v31, %v1643_v32  ;;  %v2011_v7 = vld [vmem:[#allocation5 + $0x2a4] sm:$0xf] }
  0x58   :  { %1037 = vmatpush.bf16.msra.mxu2 %v1526_v50  ;;  %v1977_v50 = vld [vmem:[#allocation5 + $0x194] sm:$0xf]  ;;  %v1486_v56 = vor.u32 %v1961_v48, %v1483_v49  ;;  %v1707_v35 = vld [vmem:[#allocation5 + $0x2d8] sm:$0xf0]  ;;  %v1635_v48 = vld [vmem:[#allocation5 + $0x248] sm:$0xf0] }
  0x59   :  { %1051 = vmatpush.bf16.msra.mxu3 %v1590_v54  ;;  %v1347_v54 = vld [vmem:[#allocation5 + $0x8] sm:$0xf0]  ;;  %v1835_v40 = vld [vmem:[#allocation5 + $0x3d8] sm:$0xf0]  ;;  %v1710_v42 = vor.u32 %v2017_v33, %v1707_v35  ;;  %v2013_v57 = vld [vmem:[#allocation5 + $0x2b4] sm:$0xf] }
  0x5a   :  { %1010 = vmatpush.bf16.msra.mxu0 %v1390_v61  ;;  %v1550_v61 = vor.u32 %v1977_v50, %v1547_v51  ;;  %v1350_v5 = vor.u32 %v1927_v53, %v1347_v54  ;;  %v1699_v50 = vld [vmem:[#allocation5 + $0x2c8] sm:$0xf0]  ;;  %v2031_v51 = vld [vmem:[#allocation5 + $0x344] sm:$0xf]  ;;  %v2009_v21 = vld [vmem:[#allocation5 + $0x294] sm:$0xf] }
  0x5b   :  { %1024 = vmatpush.bf16.msra.mxu1 %v1454_v62  ;;  %v1475_v62 = vld [vmem:[#allocation5 + $0x108] sm:$0xf0]  ;;  %v2047_v53 = vld [vmem:[#allocation5 + $0x3c4] sm:$0xf]  ;;  %vm1302_vm0 = vcmask 7168  }
  0x5c   :  { %1038 = vmatpush.bf16.msra.mxu2 %v1518_v63  ;;  %v1975_v63 = vld [vmem:[#allocation5 + $0x184] sm:$0xf]  ;;  %v1603_v32 = vld [vmem:[#allocation5 + $0x208] sm:$0xf0] }
  0x5d   :  { %1052 = vmatpush.bf16.msra.mxu3 %v1582_v4  ;;  %v2021_v4 = vld [vmem:[#allocation5 + $0x2f4] sm:$0xf]  ;;  %v1542_v14 = vor.u32 %v1975_v63, %v1539_v0  ;;  %v1819_v0 = vld [vmem:[#allocation5 + $0x3b8] sm:$0xf0]  ;;  %v1991_v31 = vld [vmem:[#allocation5 + $0x204] sm:$0xf] }
  0x5e   :  { %1011 = vmatpush.bf16.msra.mxu0 %v1382_v11  ;;  %v1478_v11 = vor.u32 %v1959_v60, %v1475_v62  ;;  %v1726_v19 = vor.u32 %v2021_v4, %v1723_v6  ;;  %v1691_v60 = vld [vmem:[#allocation5 + $0x2b8] sm:$0xf0]  ;;  %v2045_v63 = vld [vmem:[#allocation5 + $0x3b4] sm:$0xf]  ;;  %v1619_v6 = vld [vmem:[#allocation5 + $0x228] sm:$0xf0] }
  0x5f   :  { %1025 = vmatpush.bf16.msra.mxu1 %v1446_v12  ;;  %v2053_v12 = vld [vmem:[#allocation5 + $0x3f4] sm:$0xf]  ;;  %v1755_v62 = vld [vmem:[#allocation5 + $0x338] sm:$0xf0]  ;;  %v1694_v3 = vor.u32 %v2013_v57, %v1691_v60  ;;  %v1822_v8 = vor.u32 %v2045_v63, %v1819_v0  ;;  %v2007_v33 = vld [vmem:[#allocation5 + $0x284] sm:$0xf] }
  0x60   :  { %1039 = vmatpush.bf16.msra.mxu2 %v1510_v13  ;;  %v1851_v13 = vld [vmem:[#allocation5 + $0x3f8] sm:$0xf0]  ;;  %v1667_v35 = vld [vmem:[#allocation5 + $0x288] sm:$0xf0] }
  0x61   :  { %1053 = vmatpush.bf16.msra.mxu3 %v1574_v18  ;;  %v1651_v18 = vld [vmem:[#allocation5 + $0x268] sm:$0xf0]  ;;  %v1854_v23 = vor.u32 %v2053_v12, %v1851_v13  ;;  %v2043_v13 = vld [vmem:[#allocation5 + $0x3a4] sm:$0xf] }
  0x62   :  { %1012 = vmatpush.bf16.msra.mxu0 %v1374_v24  ;;  %v2035_v24 = vld [vmem:[#allocation5 + $0x364] sm:$0xf]  ;;  %v1654_v28 = vor.u32 %v2003_v16, %v1651_v18  ;;  %v1747_v12 = vld [vmem:[#allocation5 + $0x328] sm:$0xf0] }
  0x63   :  { %1026 = vmatpush.bf16.msra.mxu1 %v1438_v25  ;;  %v1779_v25 = vld [vmem:[#allocation5 + $0x368] sm:$0xf0] }
  0x64   :  { %1040 = vmatpush.bf16.msra.mxu2 %v1502_v26  ;;  %v2051_v26 = vld [vmem:[#allocation5 + $0x3e4] sm:$0xf] }
  0x65   :  { %1054 = vmatpush.bf16.msra.mxu3 %v1566_v30  ;;  %v1782_v30 = vor.u32 %v2035_v24, %v1779_v25  ;;  %v1846_v34 = vor.u32 %v2051_v26, %v1843_v27  ;;  %v2025_v24 = vld [vmem:[#allocation5 + $0x314] sm:$0xf]  ;;  %v1739_v25 = vld [vmem:[#allocation5 + $0x318] sm:$0xf0] }
  0x66   :  { %1013 = vmatpush.bf16.msra.mxu0 %v1366_v36  ;;  %v2033_v36 = vld [vmem:[#allocation5 + $0x354] sm:$0xf]  ;;  %v1803_v27 = vld [vmem:[#allocation5 + $0x398] sm:$0xf0] }
  0x67   :  { %1027 = vmatpush.bf16.msra.mxu1 %v1430_v37  ;;  %v1771_v37 = vld [vmem:[#allocation5 + $0x358] sm:$0xf0]  ;;  %v2041_v26 = vld [vmem:[#allocation5 + $0x394] sm:$0xf] }
  0x68   :  { %1041 = vmatpush.bf16.msra.mxu2 %v1494_v38  ;;  %v2049_v38 = vld [vmem:[#allocation5 + $0x3d4] sm:$0xf] }
  0x69   :  { %1055 = vmatpush.bf16.msra.mxu3 %v1558_v45  ;;  %v1774_v45 = vor.u32 %v2033_v36, %v1771_v37  ;;  %v1838_v49 = vor.u32 %v2049_v38, %v1835_v40  ;;  %v2023_v36 = vld [vmem:[#allocation5 + $0x304] sm:$0xf]  ;;  %v1731_v37 = vld [vmem:[#allocation5 + $0x308] sm:$0xf0] }
  0x6a   :  { %1014 = vmatpush.bf16.msra.mxu0 %v1358_v52  ;;  %v1763_v52 = vld [vmem:[#allocation5 + $0x348] sm:$0xf0]  ;;  %v2039_v38 = vld [vmem:[#allocation5 + $0x384] sm:$0xf] }
  0x6b   :  { %1028 = vmatpush.bf16.msra.mxu1 %v1422_v55  ;;  %v1997_v55 = vld [vmem:[#allocation5 + $0x234] sm:$0xf]  ;;  %v1795_v40 = vld [vmem:[#allocation5 + $0x388] sm:$0xf0] }
  0x6c   :  { %1042 = vmatpush.bf16.msra.mxu2 %v1486_v56  ;;  %v1627_v56 = vld [vmem:[#allocation5 + $0x238] sm:$0xf0] }
  0x6d   :  { %1056 = vmatpush.bf16.msra.mxu3 %v1550_v61  ;;  %v2029_v61 = vld [vmem:[#allocation5 + $0x334] sm:$0xf]  ;;  %v1630_v2 = vor.u32 %v1997_v55, %v1627_v56 }
  0x6e   :  { %1015 = vmatpush.bf16.msra.mxu0 %v1350_v5  ;;  %v1758_v4 = vor.u32 %v2029_v61, %v1755_v62  ;;  %v1995_v5 = vld [vmem:[#allocation5 + $0x224] sm:$0xf] }
  0x6f   :  { %1029 = vmatpush.bf16.msra.mxu1 %v1414_v9  ;;  %v1683_v9 = vld [vmem:[#allocation5 + $0x2a8] sm:$0xf0] }
  0x70   :  { %1043 = vmatpush.bf16.msra.mxu2 %v1478_v11  ;;  %v2027_v11 = vld [vmem:[#allocation5 + $0x324] sm:$0xf]  ;;  %v1686_v16 = vor.u32 %v2011_v7, %v1683_v9 }
  0x71   :  { %1057 = vmatpush.bf16.msra.mxu3 %v1542_v14  ;;  %1016 = vmatmul.bf16.vlgmr.msra.gmra.mxu0 %v2216_v58  ;;  %v1827_v58 = vld [vmem:[#allocation5 + $0x3c8] sm:$0xf0]  ;;  %v1750_v18 = vor.u32 %v2027_v11, %v1747_v12 }
  0x72   :  { %1064 = vmatpush.bf16.msrb.mxu0 %v1662_v15  ;;  %1030 = vmatmul.bf16.vlgmr.msra.gmra.mxu1 %v2222_v10  ;;  %v1766_v10 = vor.u32 %v2031_v51, %v1763_v52  ;;  %v1830_v59 = vor.u32 %v2047_v53, %v1827_v58  ;;  %v1811_v14 = vld [vmem:[#allocation5 + $0x3a8] sm:$0xf0]  ;;  %v1622_v15 = vor.u32 %v1995_v5, %v1619_v6  ;;  %v2058_v51 = vld [vmem:[#allocation7 + $0x18] sm:$0xff]  ;;  %v2057_v53 = vld [vmem:[#allocation7 + $0x10] sm:$0xff] }
  0x73   :  { %1078 = vmatpush.bf16.msrb.mxu1 %v1726_v19  ;;  %1044 = vmatmul.bf16.vlgmr.msra.gmra.mxu2 %v2218_v1  ;;  %v2015_v1 = vld [vmem:[#allocation5 + $0x2c4] sm:$0xf]  ;;  %v1993_v19 = vld [vmem:[#allocation5 + $0x214] sm:$0xf]  ;;  %v1814_v22 = vor.u32 %v2043_v13, %v1811_v14 }
  0x74   :  { %1092 = vmatpush.bf16.msrb.mxu2 %v1790_v20  ;;  %1058 = vmatmul.bf16.vlgmr.msra.gmra.mxu3 %v2224_v17  ;;  %v1638_v17 = vor.u32 %v1999_v46, %v1635_v48  ;;  %v1702_v54 = vor.u32 %v2015_v1, %v1699_v50  ;;  %v1611_v20 = vld [vmem:[#allocation5 + $0x218] sm:$0xf0]  ;;  %v1798_v46 = vor.u32 %v2039_v38, %v1795_v40  ;;  %v2061_v1 = vld [vmem:[#allocation7 + $0x30] sm:$0xff]  ;;  %v2059_v50 = vld [vmem:[#allocation7 + $0x20] sm:$0xff] }
  0x75   :  { %1106 = vmatpush.bf16.msrb.mxu3 %v1854_v23  ;;  %v1675_v23 = vld [vmem:[#allocation5 + $0x298] sm:$0xf0] }
  0x76   :  { %1065 = vmatpush.bf16.msrb.mxu0 %v1654_v28  ;;  %v1614_v28 = vor.u32 %v1993_v19, %v1611_v20  ;;  %v2062_v48 = vld [vmem:[#allocation7 + $0x38] sm:$0xff] }
  0x77   :  { %1079 = vmatpush.bf16.msrb.mxu1 %v1718_v29  ;;  %v1678_v29 = vor.u32 %v2009_v21, %v1675_v23 }
  0x78   :  { %1093 = vmatpush.bf16.msrb.mxu2 %v1782_v30  ;;  %v1742_v30 = vor.u32 %v2025_v24, %v1739_v25 }
  0x79   :  { %1107 = vmatpush.bf16.msrb.mxu3 %v1846_v34  ;;  %v1806_v34 = vor.u32 %v2041_v26, %v1803_v27  ;;  %v2068_v27 = vld [vmem:[#allocation7 + $0x68] sm:$0xff] }
  0x7a   :  { %1066 = vmatpush.bf16.msrb.mxu0 %v1646_v41  ;;  %v1606_v41 = vor.u32 %v1991_v31, %v1603_v32  ;;  %v2064_v32 = vld [vmem:[#allocation7 + $0x48] sm:$0xff] }
  0x7b   :  { %1080 = vmatpush.bf16.msrb.mxu1 %v1710_v42  ;;  %v1670_v42 = vor.u32 %v2007_v33, %v1667_v35  ;;  %v2063_v35 = vld [vmem:[#allocation7 + $0x40] sm:$0xff] }
  0x7c   :  { %1094 = vmatpush.bf16.msrb.mxu2 %v1774_v45  ;;  %v1734_v45 = vor.u32 %v2023_v36, %v1731_v37 }
  0x7d   :  { %1108 = vmatpush.bf16.msrb.mxu3 %v1838_v49  ;;  %v2060_v49 = vld [vmem:[#allocation7 + $0x28] sm:$0xff] }
  0x7e   :  { %1067 = vmatpush.bf16.msrb.mxu0 %v1638_v17 }
  0x7f   :  { %1081 = vmatpush.bf16.msrb.mxu1 %v1702_v54 }
  0x80   :  { %1095 = vmatpush.bf16.msrb.mxu2 %v1766_v10  ;;  %v2055_v10 = vld [vmem:[#allocation7] sm:$0xff] }
  0x81   :  { %1109 = vmatpush.bf16.msrb.mxu3 %v1830_v59 }
  0x82   :  { %1068 = vmatpush.bf16.msrb.mxu0 %v1630_v2 }
  0x83   :  { %1082 = vmatpush.bf16.msrb.mxu1 %v1694_v3 }
  0x84   :  { %1096 = vmatpush.bf16.msrb.mxu2 %v1758_v4 }
  0x85   :  { %1110 = vmatpush.bf16.msrb.mxu3 %v1822_v8 }
  0x86   :  { %1069 = vmatpush.bf16.msrb.mxu0 %v1622_v15 }
  0x87   :  { %1083 = vmatpush.bf16.msrb.mxu1 %v1686_v16 }
  0x88   :  { %1097 = vmatpush.bf16.msrb.mxu2 %v1750_v18  ;;  %v2070_v18 = vld [vmem:[#allocation7 + $0x78] sm:$0xff] }
  0x89   :  { %1111 = vmatpush.bf16.msrb.mxu3 %v1814_v22  ;;  %v2069_v22 = vld [vmem:[#allocation7 + $0x70] sm:$0xff] }
  0x8a   :  { %1070 = vmatpush.bf16.msrb.mxu0 %v1614_v28  ;;  %v2067_v28 = vld [vmem:[#allocation7 + $0x60] sm:$0xff] }
  0x8b   :  { %1084 = vmatpush.bf16.msrb.mxu1 %v1678_v29  ;;  %v2066_v29 = vld [vmem:[#allocation7 + $0x58] sm:$0xff] }
  0x8c   :  { %1098 = vmatpush.bf16.msrb.mxu2 %v1742_v30  ;;  %v2065_v30 = vld [vmem:[#allocation7 + $0x50] sm:$0xff] }
  0x8d   :  { %1112 = vmatpush.bf16.msrb.mxu3 %v1806_v34 }
  0x8e   :  { %1071 = vmatpush.bf16.msrb.mxu0 %v1606_v41 }
  0x8f   :  { %1085 = vmatpush.bf16.msrb.mxu1 %v1670_v42 }
  0x90   :  { %1099 = vmatpush.bf16.msrb.mxu2 %v1734_v45 }
  0x91   :  { %1113 = vmatpush.bf16.msrb.mxu3 %v1798_v46  ;;  %1072 = vmatmul.bf16.vlgmr.msrb.gmra.mxu0 %v2228_v39  ;;  %v2251_v39 = vld [vmem:[%s2272_s2] sm:$0x3] }
  0x92   :  { %1086 = vmatmul.bf16.vlgmr.msrb.gmra.mxu1 %v2232_v44  ;;  %1258 = vmatpush.bf16.msra.mxu0 %v2062_v48  ;;  %v212_v44 = vperm.slane %v2251_v39, 0  ;;  %v213_v34 = vperm.slane %v2251_v39, 1 }
  0x93   :  { %1100 = vmatmul.bf16.vlgmr.msrb.gmra.mxu2 %v2230_v43  ;;  %1272 = vmatpush.bf16.msra.mxu1 %v2070_v18 }
  0x94   :  { %1114 = vmatmul.bf16.vlgmr.msrb.gmra.mxu3 %v2234_v47  ;;  %v2056_v47 = vld [vmem:[#allocation7 + $0x8] sm:$0xff] }
  0x96   :  { %1259 = vmatpush.bf16.msra.mxu0 %v2061_v1 }
  0x97   :  { %1273 = vmatpush.bf16.msra.mxu1 %v2069_v22 }
  0x9a   :  { %1260 = vmatpush.bf16.msra.mxu0 %v2060_v49 }
  0x9b   :  { %1274 = vmatpush.bf16.msra.mxu1 %v2068_v27 }
  0x9e   :  { %1261 = vmatpush.bf16.msra.mxu0 %v2059_v50 }
  0x9f   :  { %1275 = vmatpush.bf16.msra.mxu1 %v2067_v28 }
  0xa2   :  { %1262 = vmatpush.bf16.msra.mxu0 %v2058_v51 }
  0xa3   :  { %1276 = vmatpush.bf16.msra.mxu1 %v2066_v29 }
  0xa6   :  { %1263 = vmatpush.bf16.msra.mxu0 %v2057_v53 }
  0xa7   :  { %1277 = vmatpush.bf16.msra.mxu1 %v2065_v30 }
  0xaa   :  { %1264 = vmatpush.bf16.msra.mxu0 %v2056_v47 }
  0xab   :  { %1278 = vmatpush.bf16.msra.mxu1 %v2064_v32 }
  0xae   :  { %v905_v52 = vpop.f32.mrf.mxu0  ;;  %1265 = vmatpush.bf16.msra.mxu0 %v2055_v10 }
  0xaf   :  { %v919_v43 = vpop.f32.mrf.mxu1  ;;  %v906_v17 = vadd.f32 %v905_v52, %v212_v44  ;;  %1279 = vmatpush.bf16.msra.mxu1 %v2063_v35 }
  0xb1   :  { %v920_v57 = vadd.f32 %v919_v43, %v906_v17 }
  0xb6   :  { %v933_v58 = vpop.f32.mrf.mxu2  ;;  %v907_v55 = vpop.f32.mrf.mxu0 }
  0xb7   :  { %v947_v54 = vpop.f32.mrf.mxu3  ;;  %v921_v56 = vpop.f32.mrf.mxu1  ;;  %v908_v59 = vadd.f32 %v907_v55, %v212_v44  ;;  %v934_v60 = vadd.f32 %v933_v58, %v920_v57 }
  0xb9   :  { %v922_v62 = vadd.f32 %v921_v56, %v908_v59  ;;  %v948_v0 = vadd.f32 %v947_v54, %v934_v60 }
  0xbe   :  { %v935_v61 = vpop.f32.mrf.mxu2 }
  0xbf   :  { %v949_v63 = vpop.f32.mrf.mxu3  ;;  %v936_v4 = vadd.f32 %v935_v61, %v922_v62 }
  0xc1   :  { %v950_v6 = vadd.f32 %v949_v63, %v936_v4  ;;  %v2080_v4 = vld [vmem:[%s2274_s4] ss:$0 sm:$0xff] }
  0xce   :  { %v961_v2 = vpop.f32.mrf.mxu0 }
  0xcf   :  { %v975_v3 = vpop.f32.mrf.mxu1  ;;  %v962_v5 = vadd.f32 %v961_v2, %v948_v0 }
  0xd1   :  { %v976_v8 = vadd.f32 %v975_v3, %v962_v5 }
  0xd6   :  { %v989_v7 = vpop.f32.mrf.mxu2  ;;  %v963_v9 = vpop.f32.mrf.mxu0 }
  0xd7   :  { %v1003_v11 = vpop.f32.mrf.mxu3  ;;  %v964_v12 = vadd.f32 %v963_v9, %v950_v6  ;;  %v977_v13 = vpop.f32.mrf.mxu1  ;;  %v990_v14 = vadd.f32 %v989_v7, %v976_v8  ;;  %v2081_v8 = vld [vmem:[%s2275_s5] ss:$0 sm:$0xff] }
  0xd9   :  { %v978_v15 = vadd.f32 %v977_v13, %v964_v12  ;;  %v1004_v19 = vadd.f32 %v1003_v11, %v990_v14 }
  0xdb   :  { %v1120_v24 = vmax.f32 %v1004_v19, 0.0  ;;  %v1299_v19 = vstv %s2276_s6 }
  0xde   :  { %v991_v16 = vpop.f32.mrf.mxu2 }
  0xdf   :  { %v992_v20 = vadd.f32 %v991_v16, %v978_v15  ;;  %v1005_v21 = vpop.f32.mrf.mxu3 }
  0xe1   :  { %v1006_v23 = vadd.f32 %v1005_v21, %v992_v20 }
  0xe3   :  { %v1122_v25 = vmax.f32 %v1006_v23, 0.0 }
  0xe5   :  { %v1124_v26 = vpack.c.bf16 %v1122_v25, %v1120_v24 }
  0xe7   :  { %1266 = vmatmul.bf16.vlgmr.msra.gmra.mxu0 %v1124_v26 }
  0xee   :  { %v1017_v31 = vpop.f32.mrf.mxu0 }
  0xef   :  { %v1031_v33 = vpop.f32.mrf.mxu1  ;;  %v1018_v38 = vadd.f32 %v1017_v31, %v213_v34 }
  0xf1   :  { %v1032_v42 = vadd.f32 %v1031_v33, %v1018_v38 }
  0xf6   :  { %v1045_v36 = vpop.f32.mrf.mxu2  ;;  %v1019_v40 = vpop.f32.mrf.mxu0 }
  0xf7   :  { %v1059_v37 = vpop.f32.mrf.mxu3  ;;  %v1033_v41 = vpop.f32.mrf.mxu1  ;;  %v1020_v45 = vadd.f32 %v1019_v40, %v213_v34  ;;  %v1046_v48 = vadd.f32 %v1045_v36, %v1032_v42 }
  0xf9   :  { %v1034_v1 = vadd.f32 %v1033_v41, %v1020_v45  ;;  %v1060_v52 = vadd.f32 %v1059_v37, %v1046_v48 }
  0xfe   :  { %v1047_v46 = vpop.f32.mrf.mxu2 }
  0xff   :  { %v1061_v49 = vpop.f32.mrf.mxu3  ;;  %v1048_v53 = vadd.f32 %v1047_v46, %v1034_v1 }
 0x101   :  { %v1062_v39 = vadd.f32 %v1061_v49, %v1048_v53 }
 0x10e   :  { %v1073_v50 = vpop.f32.mrf.mxu0 }
 0x10f   :  { %v1087_v51 = vpop.f32.mrf.mxu1  ;;  %v1074_v43 = vadd.f32 %v1073_v50, %v1060_v52 }
 0x111   :  { %v1088_v17 = vadd.f32 %v1087_v51, %v1074_v43 }
 0x116   :  { %v1101_v44 = vpop.f32.mrf.mxu2  ;;  %v1075_v58 = vpop.f32.mrf.mxu0 }
 0x117   :  { %v1115_v47 = vpop.f32.mrf.mxu3  ;;  %v1076_v54 = vadd.f32 %v1075_v58, %v1062_v39  ;;  %v1102_v10 = vadd.f32 %v1101_v44, %v1088_v17  ;;  %v1089_v55 = vpop.f32.mrf.mxu1 }
 0x119   :  { %v1090_v56 = vadd.f32 %v1089_v55, %v1076_v54  ;;  %v1116_v59 = vadd.f32 %v1115_v47, %v1102_v10 }
 0x11b   :  { %v1121_v63 = vmax.f32 %v1116_v59, 0.0 }
 0x11e   :  { %v1103_v57 = vpop.f32.mrf.mxu2 }
 0x11f   :  { %v1104_v60 = vadd.f32 %v1103_v57, %v1090_v56  ;;  %v1117_v61 = vpop.f32.mrf.mxu3 }
 0x121   :  { %v1118_v62 = vadd.f32 %v1117_v61, %v1104_v60 }
 0x123   :  { %v1123_v0 = vmax.f32 %v1118_v62, 0.0 }
 0x125   :  { %v1125_v2 = vpack.c.bf16 %v1123_v0, %v1121_v63 }
 0x127   :  { %1280 = vmatmul.bf16.vlgmr.msra.gmra.mxu1 %v1125_v2 }
 0x164   :  { %v1267_v3 = vpop.f32.mrf.mxu0 }
 0x165   :  { %v1268_v5 = vadd.f32 %v2080_v4, %v1267_v3 }
 0x16c   :  { %v1269_v11 = vpop.f32.mrf.mxu0 }
 0x16d   :  { %v1270_v13 = vadd.f32 %v2080_v4, %v1269_v11 }
 0x1a4   :  { %v1281_v6 = vpop.f32.mrf.mxu1 }
 0x1a5   :  { %v1282_v7 = vadd.f32 %v1281_v6, %v1268_v5 }
 0x1a7   :  { %v1286_v9 = vmax.f32 %v1282_v7, 0.0 }
 0x1a9   :  { %v1292_v12 = vmul.f32 %v2081_v8, %v1286_v9 }
 0x1ab   :  { %1294 = vadd.xlane.f32.xlu0 %v1292_v12 }
 0x1ac   :  { %v1283_v14 = vpop.f32.mrf.mxu1 }
 0x1ad   :  { %v1284_v15 = vadd.f32 %v1283_v14, %v1270_v13 }
 0x1af   :  { %v1287_v16 = vmax.f32 %v1284_v15, 0.0 }
 0x1b1   :  { %v1293_v18 = vmul.f32 %v2081_v8, %v1287_v16 }
 0x1b3   :  { %1296 = vadd.xlane.f32.xlu0 %v1293_v18 }
 0x21e   :  { %v1295_v20 = vpop.xlane.xlu0 %1294 }
 0x21f   :  { %v1300_v21 = vadd.f32 %v1299_v19, %v1295_v20 }
 0x221   :  { %1303 = vst.msk [vmem:[%s2277_s7] sm:$0xff] %vm1302_vm0, %v1300_v21 }
 0x226   :  { %v1297_v22 = vpop.xlane.xlu0 %1296 }
 0x227   :  { %v1301_v23 = vadd.f32 %v1299_v19, %v1297_v22 }
 0x229   :  { %1304 = vst.msk [vmem:[%s2277_s7 + $0x8] sm:$0xff] %vm1302_vm0, %v1301_v23 }
 0x22a   :  { %1309 = vsyncpa [#allocation4], 1 }
 0x22b   :  { %1310 = vsyncpa [#allocation6], 1 }

</bundles_post_ra>
